<compile_context>
chip_gen: v7x
topology: tpu7x:2x2x1
jax: 0.10.0
libtpu: 0.0.40
codegen_flags: <defaults>
</compile_context>

<pallas_src>
import functools

import jax
import jax.numpy as jnp
from jax.experimental import pallas as pl
from jax.experimental.pallas import tpu as pltpu


def _cdiv(a, b):
    return -(-a // b)


def _round_up(x, m):
    return ((x + m - 1) // m) * m


# ----------------------------------------------------------------------------
# Kernels
# ----------------------------------------------------------------------------
def _matmul_bias_single_k(x_ref, w_ref, b_ref, o_ref, *, precision):
    """Whole reduction in one step: no accumulator scratch, direct store."""
    acc = jnp.dot(
        x_ref[...], w_ref[...],
        preferred_element_type=jnp.float32, precision=precision,
    )
    o_ref[...] = (acc + b_ref[...].astype(jnp.float32)).astype(o_ref.dtype)


def _matmul_bias_multi_k(x_ref, w_ref, b_ref, o_ref, acc_ref, *, precision):
    """One (tm, tn) output tile; accumulates over the K grid axis."""
    k = pl.program_id(2)

    @pl.when(k == 0)
    def _():
        acc_ref[...] = jnp.zeros_like(acc_ref)

    acc_ref[...] += jnp.dot(
        x_ref[...], w_ref[...],
        preferred_element_type=jnp.float32, precision=precision,
    )

    # Epilogue exactly once per output tile: bias add in f32, cast, store.
    @pl.when(k == pl.num_programs(2) - 1)
    def _():
        o_ref[...] = (
            acc_ref[...] + b_ref[...].astype(jnp.float32)
        ).astype(o_ref.dtype)


# ----------------------------------------------------------------------------
# Tiling heuristics
# ----------------------------------------------------------------------------
def _pick_tiles(M, K, N, x_dtype, w_dtype, b_dtype, out_dtype):
    xb = jnp.dtype(x_dtype).itemsize
    wb = jnp.dtype(w_dtype).itemsize
    bb = jnp.dtype(b_dtype).itemsize
    ob = jnp.dtype(out_dtype).itemsize

    # Generation-aware VMEM budget (v7x: 64 MiB / TC; v5e/v6e: 128 MiB).
    try:
        vmem_cap = int(pltpu.get_tpu_info().vmem_capacity_bytes)
    except Exception:  # no TPU info available: assume the smallest (v7x)
        vmem_cap = 64 * 1024 * 1024
    budget = int(vmem_cap * 0.6)  # headroom for Mosaic internals / pipelining

    # Sublane packing: f32 -> 8, bf16 -> 16, int8/fp8 -> 32.
    sub = max(8, 32 // xb)

    # ---- N (lane) tile: 256-aligned panels feed the v6e/v7x 256x256 MXU;
    # small N stays one whole-dim tile (block dim == full dim is legal).
    if N <= 512:
        tn = N
    else:
        tn = 512

    # ---- M (sublane) tile.
    if M >= 512:
        tm = 512
    elif M >= 256:
        tm = 256
    else:
        tm = _round_up(M, sub)

    # Keep at least 2 parallel output tiles so the v7x second TensorCore
    # (sharded over the "parallel" grid axes) has work.
    if _cdiv(M, tm) * _cdiv(N, tn) < 2 and M >= 2 * sub:
        tm = max(sub, _round_up(_cdiv(M, 2), sub))

    # ---- K (reduction) tile, sized against the double-buffered footprint.
    per_k = 2 * (tm * xb + tn * wb)           # x + w panels (double-buffered), per K elt
    fixed = 2 * (tm * tn * ob + tn * bb)      # output tile + bias (double-buffered)
    acc_bytes = tm * tn * 4                   # f32 accumulator scratch (multi-K only)

    if K * per_k + fixed <= budget:
        tk = K                                # single reduction step, no K padding
        grid_k = 1
    else:
        max_tk = (budget - fixed - acc_bytes) // per_k
        tk = int(min(2048, max(256, (max_tk // 256) * 256)))
        grid_k = _cdiv(K, tk)
    K_pad = tk * grid_k

    footprint = 2 * (tm * tk * xb + tk * tn * wb + tn * bb + tm * tn * ob)
    if grid_k > 1:
        footprint += acc_bytes
    vmem_limit = int(min(0.9 * vmem_cap, max(2 * footprint, 32 * 1024 * 1024)))

    return tm, tk, tn, K_pad, grid_k, vmem_limit


# ----------------------------------------------------------------------------
# Wrapper
# ----------------------------------------------------------------------------
@functools.partial(jax.jit, static_argnames=("precision",))
def conv1d_rf1(x, w, b, precision=jax.lax.Precision.HIGHEST):
    """Pallas equivalent of Conv1D(rf=1).forward.

    x: (..., in_dim);  w: (in_dim, out_dim);  b: (out_dim,)
    returns: (..., out_dim) in x.dtype
    """
    in_dim = x.shape[-1]
    out_dim = w.shape[-1]
    size_out = x.shape[:-1] + (out_dim,)
    out_dtype = x.dtype

    x2d = x.reshape(-1, in_dim)
    M, K, N = x2d.shape[0], in_dim, out_dim

    tm, tk, tn, K_pad, grid_k, vmem_limit = _pick_tiles(
        M, K, N, x.dtype, w.dtype, b.dtype, out_dtype
    )

    # Only the reduction axis ever needs zero padding (padding contributes
    # exact zeros to the dot).  Out-of-bounds rows/columns of boundary M/N
    # blocks are load/store-masked by Pallas and never reach HBM, so no M/N
    # padding and no output slice are required.
    if K_pad != K:
        x2d = jnp.pad(x2d, ((0, 0), (0, K_pad - K)))
        w = jnp.pad(w, ((0, K_pad - K), (0, 0)))
    b2d = b.reshape(1, N)

    grid_m = _cdiv(M, tm)
    grid_n = _cdiv(N, tn)

    cost = pl.CostEstimate(
        flops=2 * M * K_pad * N,
        transcendentals=0,
        bytes_accessed=(
            M * K_pad * x2d.dtype.itemsize * grid_n      # x panel re-read per N tile
            + K_pad * N * w.dtype.itemsize * grid_m      # w panel re-read per M tile
            + N * b.dtype.itemsize * grid_m
            + M * N * jnp.dtype(out_dtype).itemsize
        ),
    )

    if grid_k == 1:
        y2d = pl.pallas_call(
            functools.partial(_matmul_bias_single_k, precision=precision),
            out_shape=jax.ShapeDtypeStruct((M, N), out_dtype),
            grid=(grid_m, grid_n),
            in_specs=[
                pl.BlockSpec((tm, K_pad), lambda i, j: (i, 0)),   # activations
                pl.BlockSpec((K_pad, tn), lambda i, j: (0, j)),   # weights
                pl.BlockSpec((1, tn), lambda i, j: (0, j)),       # bias tracks N tile
            ],
            out_specs=pl.BlockSpec((tm, tn), lambda i, j: (i, j)),
            compiler_params=pltpu.CompilerParams(
                dimension_semantics=("parallel", "parallel"),
                vmem_limit_bytes=vmem_limit,
            ),
            cost_estimate=cost,
        )(x2d, w, b2d)
    else:
        y2d = pl.pallas_call(
            functools.partial(_matmul_bias_multi_k, precision=precision),
            out_shape=jax.ShapeDtypeStruct((M, N), out_dtype),
            grid=(grid_m, grid_n, grid_k),
            in_specs=[
                pl.BlockSpec((tm, tk), lambda i, j, k: (i, k)),   # activations
                pl.BlockSpec((tk, tn), lambda i, j, k: (k, j)),   # weights
                pl.BlockSpec((1, tn), lambda i, j, k: (0, j)),    # bias tracks N tile
            ],
            out_specs=pl.BlockSpec((tm, tn), lambda i, j, k: (i, j)),
            scratch_shapes=[pltpu.VMEM((tm, tn), jnp.float32)],
            compiler_params=pltpu.CompilerParams(
                dimension_semantics=("parallel", "parallel", "arbitrary"),
                vmem_limit_bytes=vmem_limit,
            ),
            cost_estimate=cost,
        )(x2d, w, b2d)

    return y2d.reshape(size_out)


if __name__ == "__main__":
    # Module config (rf == 1 path).
    in_dim, out_dim = 32, 48
    batch, seq = 2, 8

    key = jax.random.PRNGKey(0)
    kx, kw = jax.random.split(key)

    # Mirror nn.init.normal_(w, std=0.02), b = zeros.
    w = (0.02 * jax.random.normal(kw, (in_dim, out_dim))).astype(jnp.float32)
    b = jnp.zeros((out_dim,), jnp.float32)

    x = jax.random.normal(kx, (batch, seq, in_dim), dtype=jnp.float32)

    y = conv1d_rf1(x, w, b)
    jax.block_until_ready(y)

    # Reference check against plain JAX at the same (HIGHEST) matmul precision
    # (same math as torch.addmm + reshape).
    y_ref = (
        jnp.dot(x.reshape(-1, in_dim), w, precision=jax.lax.Precision.HIGHEST) + b
    ).reshape(batch, seq, out_dim)
    assert y.shape == (batch, seq, out_dim)
    assert jnp.allclose(y, y_ref, atol=1e-5, rtol=1e-5)

    print("KERNEL_OK")
</pallas_src>

<mosaic_0001>
module attributes {stable_mosaic.version = 11 : i64} {
  func.func @_matmul_bias_single_k(%arg0: i32, %arg1: i32, %arg2: memref<8x32xf32, #tpu.memory_space<vmem>>, %arg3: memref<32x48xf32, #tpu.memory_space<vmem>>, %arg4: memref<1x48xf32, #tpu.memory_space<vmem>>, %arg5: memref<8x48xf32, #tpu.memory_space<vmem>>) attributes {dimension_semantics = [#tpu.dimension_semantics<parallel>, #tpu.dimension_semantics<parallel>], iteration_bounds = array<i64: 2, 1>, scalar_prefetch = 0 : i64, scratch_operands = 0 : i64, tpu.core_type = #tpu.core_type<tc>, window_params = [{transform_indices = @transform_0, window_bounds = array<i64: 8, 32>}, {transform_indices = @transform_1, window_bounds = array<i64: 32, 48>}, {transform_indices = @transform_2, window_bounds = array<i64: 1, 48>}, {transform_indices = @transform_3, window_bounds = array<i64: 8, 48>}]} {
    %c0 = arith.constant 0 : index
    %c0_0 = arith.constant 0 : index
    %0 = vector.load %arg2[%c0, %c0_0] : memref<8x32xf32, #tpu.memory_space<vmem>>, vector<8x32xf32>
    %c0_1 = arith.constant 0 : index
    %c0_2 = arith.constant 0 : index
    %1 = vector.load %arg3[%c0_1, %c0_2] : memref<32x48xf32, #tpu.memory_space<vmem>>, vector<32x48xf32>
    %cst = arith.constant dense<0.000000e+00> : vector<8x48xf32>
    %2 = tpu.matmul %0, %1, %cst {dimension_numbers = #tpu.dot_dimension_numbers<[1], [0], [0], [1], [0, 0, 1, 1], [], []>, precision = #tpu.contract_precision<fp32>} : vector<8x32xf32>, vector<32x48xf32>, vector<8x48xf32> -> vector<8x48xf32>
    %c0_3 = arith.constant 0 : index
    %c0_4 = arith.constant 0 : index
    %3 = vector.load %arg4[%c0_3, %c0_4] : memref<1x48xf32, #tpu.memory_space<vmem>>, vector<1x48xf32>
    %4 = vector.broadcast %3 : vector<1x48xf32> to vector<8x48xf32>
    %5 = arith.addf %2, %4 : vector<8x48xf32>
    %c0_5 = arith.constant 0 : index
    %c0_6 = arith.constant 0 : index
    %6 = vector.load %arg5[%c0_5, %c0_6] : memref<8x48xf32, #tpu.memory_space<vmem>>, vector<8x48xf32>
    tpu.vector_store %arg5[%c0_5, %c0_6], %5 {strides = array<i32>} : memref<8x48xf32, #tpu.memory_space<vmem>>, vector<8x48xf32>,
    return
  }
  func.func @transform_0(%arg0: i32, %arg1: i32) -> (i32, i32) {
    %c0_i32 = arith.constant 0 : i32
    %c0_i32_0 = arith.constant 0 : i32
    return %arg0, %c0_i32 : i32, i32
  }
  func.func @transform_1(%arg0: i32, %arg1: i32) -> (i32, i32) {
    %c0_i32 = arith.constant 0 : i32
    %c0_i32_0 = arith.constant 0 : i32
    return %c0_i32, %arg1 : i32, i32
  }
  func.func @transform_2(%arg0: i32, %arg1: i32) -> (i32, i32) {
    %c0_i32 = arith.constant 0 : i32
    %c0_i32_0 = arith.constant 0 : i32
    return %c0_i32, %arg1 : i32, i32
  }
  func.func @transform_3(%arg0: i32, %arg1: i32) -> (i32, i32) {
    %c0_i32 = arith.constant 0 : i32
    return %arg0, %arg1 : i32, i32
  }
}

</mosaic_0001>

<bundles_post_ra>
// kernel: conv1d_rf1.1
= control target key start
LH: loop header
LB: loop body
LE: loop exit
PB: predicated region body
PF: predicated region fallthrough
CT: control target
= control target key end

     0   :  { %8 = vsyncpa [#allocation3], 0  ;;  %s1513_s0 = inlined_call_operand.hbm [shape: f32[16,32], index: 0, kind: input, shape index: {}]   ;;  %s1514_s1 = inlined_call_operand.hbm [shape: f32[32,48], index: 1, kind: input, shape index: {}]   ;;  %s1515_s2 = inlined_call_operand.vmem [shape: f32[1,48], index: 2, kind: input, shape index: {}]   ;;  %s1516_s3 = inlined_call_operand.hbm [shape: f32[16,48], index: 3, kind: output, shape index: {}]  }
   0x1   :  { %10 = vsyncpa [#allocation3 + $0x1], 0 }
   0x2   :  { %11 = vsyncpa [#allocation6], 0 }
   0x3   :  { %12 = vsyncpa [#allocation4], 0 }
   0x4   :  { %14 = vsyncpa [#allocation4 + $0x1], 0  ;;  %s1268_s12 = smov 0   ;;  %s1270_s13 = smov 0  }
   0x5   :  { %s1272_s14 = smov 0   ;;  %s1274_s15 = smov 0  }
   0x6   :  { %s1276_s16 = smov 0   ;;  %s1278_s17 = smov 0  }
   0x7 LB: > { %s857_s18 = sadd.s32 4294967295, %s1238_s17   ;;  %s858_s19 = sadd.s32 4294967294, %s1238_s17   ;;  %s1238_s17 = sphi %s1278_s17, %s20_s17   ;;  %s1234_s16 = sphi %s1276_s16, %s1540_s16   ;;  %s1230_s15 = sphi %s1274_s15, %s1539_s15   ;;  %s1226_s14 = sphi %s1272_s14, %s1538_s14   ;;  %s1222_s13 = sphi %s1270_s13, %s1537_s13   ;;  %s1218_s12 = sphi %s1268_s12, %s1536_s12  }
   0x8   : > { %p52_p0 = scmp.ne.s32.totalorder %s1222_s13, %s1218_s12  ;;  %p1302_p1 = scmp.eq.s32.totalorder %s857_s18, 0 }
   0x9   : > { %p1306_p2 = scmp.eq.s32.totalorder %s857_s18, 1  ;;  %p136_p3 = scmp.eq.s32.totalorder %s858_s19, 1 }
   0xa   : > { %s1521_s20 = scalar_select %p1302_p1, 1, 0 }
   0xb   : > { %s1522_s21 = scalar_select %p1306_p2, 1, 0 }
   0xc   : > { %p1312_p4 = por %p1302_p1, %p52_p0  ;;  %p859_p5 = scmp.ge.s32.totalorder %s1238_s17, 1 }
   0xd   : > { %p1317_p6 = por %p136_p3, %p52_p0  ;;  %p143_p7 = scmp.lt.s32.totalorder %s1238_s17, 3 }
   0xe   : > { %s1523_s22 = scalar_select %p1312_p4, 1, 0 }
   0xf   : > { %s1524_s23 = scalar_select %p1317_p6, 1, 0 }
  0x10   : > { %p1322_p8 = pnand %p859_p5, %p143_p7  ;;  %s1240_s25 = smov [#allocation5]  }
  0x11   : > { %s157_s26 = sshll.u32 %s1240_s25, 4  ;;  %s32_s28 = sadd.s32 1, %s1234_s16  ;;  %s158_s26 = int_to_ptr.vmem [resolvable:$true] %s157_s26 }
  0x12   : > { %s1525_s24 = scalar_select %p1322_p8, 1, 0 }
  0x13   : > { %p1024_p9 = pneg %p1322_p8  ;;  %s1094_s4 = scalar_lea.hbm %s1514_s1, 512 }
  0x14   : > { %p1095_p12 = scmp.ne.s32.totalorder %s1514_s1, %s1094_s4  ;;  %p1101_p5 = scmp.lt.u32.totalorder %s1094_s4, %s1514_s1 }
  0x15   : > { %p1331_p11 = pnand %p1024_p9, %p1302_p1 }
  0x17   : > { %p1096_p13 = pneg %p1331_p11 }
  0x19   : > { %p1097_p0 = pnand %p1096_p13, %p1095_p12 }
  0x1b   : > { %p1098_p3 = pneg %p1097_p0 }
  0x1d   : > { %p1103_p7 = pnand %p1101_p5, %p1098_p3 }
  0x1f   : > { %1106 = shalt.err (!%p1103_p7)
}
  0x20   : > { %s1107_s9 = scalar_lea.vmem %s158_s26, 512  ;;  %p1115_p1 = scmp.lt.s32.totalorder %s158_s26, %s158_s26 }
  0x21   : > { %p1108_p9 = scmp.ne.s32.totalorder %s158_s26, %s1107_s9  ;;  %p1116_p4 = scmp.lt.s32.totalorder %s1107_s9, %s1107_s9 }
  0x23   : > { %p1110_p10 = pnand %p1108_p9, %p1096_p13  ;;  %p1117_p8 = por %p1116_p4, %p1115_p1 }
  0x25   : > { %p1111_p6 = pneg %p1110_p10 }
  0x27   : > { %p1118_p2 = pnand %p1117_p8, %p1111_p6 }
  0x29   : > { %1121 = shalt.err (!%p1118_p2)
}
  0x2a   : > { %s1241_s10 = smov 128   ;;  %s1242_s11 = smov 8  }
  0x2b   : > { %1027 = dma.hbm_to_vmem [thread:$0]  (!%p1331_p11), %s1514_s1, 512, %s158_s26, [#allocation6], %s1241_s10, %s1241_s10, %s1242_s11  }
  0x2c   : > { %p34_p1 = scmp.ge.s32.totalorder %s32_s28, 2  ;;  %s39_s25 = sadd.s32 1, %s1226_s14 }
  0x2d   : > { %p46_p2 = scmp.ne.s32.totalorder %s1226_s14, %s1222_s13  ;;  %p47_p4 = scmp.eq.s32.totalorder %s1238_s17, 0 }
  0x2e   : > { %s1542_s28 = smov (%p34_p1, %s32_s28), 0  ;;  %p1528_p8 = scmp.ne.s32.totalorder %s1522_s21, 0 }
  0x2f   : > { %p1358_p6 = por %p47_p4, %p46_p2  ;;  %s36_s27 = ssub.s32 %s1234_s16, %s1542_s28 }
  0x30   : > { %p1364_p10 = por %p1528_p8, %p46_p2  ;;  %p1037_p12 = scmp.lt.s32.totalorder %s1238_s17, 2 }
  0x31   : > { %p37_p11 = scmp.eq.s32.totalorder %s36_s27, 0  ;;  %s177_s26 = sand.u32 1, %s1226_s14  }
  0x32   : > { %s863_s4 = sshll.u32 %s177_s26, 3  ;;  %s864_s6 = sshll.u32 %s1234_s16, 7 }
  0x33   : > { %s1373_s5 = scalar_select %p37_p11, %s1226_s14, %s39_s25  }
  0x34   : > { %s1379_s9 = scalar_lea.hbm %s1513_s0, %s864_s6  ;;  %s181_s21 = scalar_lea.vmem [#allocation2], %s863_s4 }
  0x35   : > { %s188_s10 = sshll.u32 %s181_s21, 4  ;;  %p1385_p13 = pnand %p1037_p12, %p1358_p6  ;;  %s1381_s10 = int_to_ptr.vmem [resolvable:$true] %s188_s10 }
  0x36   : > { %s178_s18 = scalar_lea.sflag [#allocation3], %s177_s26  ;;  %s1122_s19 = scalar_lea.hbm %s1379_s9, 128 }
  0x37   : > { %p1123_p0 = scmp.ne.s32.totalorder %s1379_s9, %s1122_s19  ;;  %p1124_p3 = pneg %p1385_p13 }
  0x38   : > { %s1127_s4 = scalar_lea.hbm %s1513_s0, 256  ;;  %p1128_p9 = scmp.lt.u32.totalorder %s1379_s9, %s1513_s0 }
  0x39   : > { %p1125_p5 = pnand %p1124_p3, %p1123_p0  ;;  %p1129_p1 = scmp.lt.u32.totalorder %s1127_s4, %s1122_s19 }
  0x3a   : > { %p1131_p4 = scmp.lt.u32.totalorder %s1122_s19, %s1379_s9 }
  0x3b   : > { %p1126_p7 = pneg %p1125_p5  ;;  %p1130_p2 = por %p1129_p1, %p1128_p9 }
  0x3d   : > { %p1132_p6 = por %p1131_p4, %p1130_p2 }
  0x3f   : > { %p1133_p8 = pnand %p1132_p6, %p1126_p7 }
  0x41   : > { %1136 = shalt.err (!%p1133_p8)
}
  0x42   : > { %s1137_s26 = scalar_lea.vmem %s1381_s10, 128  ;;  %s1243_s7 = smov [#allocation2]  }
  0x43   : > { %p1138_p12 = scmp.ne.s32.totalorder %s1381_s10, %s1137_s26  ;;  %s1142_s8 = sshll.u32 %s1243_s7, 4  ;;  %s1143_s8 = int_to_ptr.vmem [resolvable:$false] %s1142_s8 }
  0x44   : > { %s1144_s21 = scalar_lea.vmem %s1143_s8, 256  ;;  %p1145_p5 = scmp.lt.s32.totalorder %s1381_s10, %s1143_s8 }
  0x45   : > { %p1140_p11 = pnand %p1138_p12, %p1124_p3  ;;  %p1146_p9 = scmp.lt.s32.totalorder %s1144_s21, %s1137_s26 }
  0x47   : > { %p1141_p0 = pneg %p1140_p11  ;;  %p1147_p1 = por %p1146_p9, %p1145_p5 }
  0x49   : > { %p1148_p2 = pnand %p1147_p1, %p1141_p0 }
  0x4b   : > { %1151 = shalt.err (!%p1148_p2)
}
  0x4c   : > { %1031 = dma.hbm_to_vmem [thread:$0]  (!%p1385_p13), %s1379_s9, 128, %s1381_s10, %s178_s18  }
  0x4d   : > { %p1531_p7 = scmp.ne.s32.totalorder %s1525_s24, 0 }
  0x4e   : > { %s1417_s19 = sand.u32 (!%p1531_p7), 1, %s1222_s13   ;;  %p1532_p3 = scmp.ne.s32.totalorder (!%p1531_p7), %s1523_s22, 0 }
  0x4f   : > { %197 = sbr.rel (%p1531_p7) target bundleno = 351 (0x15f), region = 32  ;;  %s866_s25 = sshll.u32 (!%p1531_p7), %s1417_s19, 3 }
  0x50   : > { %s200_s27 = scalar_lea.sflag (!%p1531_p7), [#allocation3], %s1417_s19  ;;  %s203_s4 = scalar_lea.vmem (!%p1531_p7), [#allocation2], %s866_s25 }
  0x56   : > { %1205 = dma.done.wait (%p1532_p3), %s200_s27, 128  }
  0x57   : > { %1207 = vsyncadd (%p1532_p3), %s200_s27, 4294967168  ;;  %p1533_p13 = scmp.ne.s32.totalorder %s1521_s20, 0 }
  0x59   : > { %1209 = dma.done.wait (%p1533_p13), [#allocation6], 512  }
  0x5a   : > { %1211 = vsyncadd (%p1533_p13), [#allocation6], 4294966784  ;;  %v1244_v0 = vmov 0.0|0.0   ;;  %vm1245_vm0 = vmmov 0   ;;  %v1246_v1 = vmov 0.0   ;;  %vm248_vm1 = vcmask 261120  }
  0x5b   : > { %970 = vmatprep.subr.bf16.mxu1 %v1244_v0  ;;  %988 = vmatprep.subr.bf16.mxu0 %v1244_v0  ;;  %v237_v2 = vld [vmem:[#allocation5] sm:$0xff]  ;;  %v238_v3 = vld [vmem:[#allocation5 + $0x8] sm:$0xff]  ;;  %v239_v4 = vld [vmem:[#allocation5 + $0x10] sm:$0xff]  ;;  %s871_s24 = sshll.u32 %s1230_s15, 7  ;;  %s232_s9 = scalar_lea.vmem [#allocation7], %s866_s25  ;;  %vm737_vm2 = vcmask 392192  }
  0x5c   : > { %912 = vmatprep.mubr.msk.f32.mxu1 %vm1245_vm0, %v1246_v1  ;;  %945 = vmatprep.mubr.msk.f32.mxu0 %vm1245_vm0, %v1246_v1  ;;  %v253_v5 = vand.u32 4294901760, %v237_v2  ;;  %v256_v6 = vand.u32 4294901760, %v238_v3  ;;  %v240_v7 = vld [vmem:[#allocation5 + $0x18] sm:$0xff]  ;;  %v259_v8 = vand.u32 4294901760, %v239_v4  ;;  %v869_v41 = vld [vmem:[%s1515_s2] ss:$0 sm:$0xff]  ;;  %s1464_s29 = scalar_lea.hbm %s1516_s3, %s871_s24 }
  0x5d   : > { %v236_v9 = vld [vmem:[%s203_s4] sm:$0xff]  ;;  %v262_v10 = vand.u32 4294901760, %v240_v7  ;;  %s754_s10 = sshll.u32 %s232_s9, 4  ;;  %s740_s6 = scalar_lea.sflag [#allocation4], %s1417_s19  ;;  %s1466_s10 = int_to_ptr.vmem [resolvable:$true] %s754_s10 }
  0x5e   : > { %v250_v11 = vsel %vm248_vm1, %v236_v9, 0  ;;  %v971_v12 = vpack.c.bf16 %v256_v6, %v253_v5  ;;  %v333_v13 = vsub.f32 %v237_v2, %v253_v5  ;;  %v340_v14 = vsub.f32 %v238_v3, %v256_v6  ;;  %s1152_s15 = scalar_lea.vmem %s1466_s10, 128  ;;  %s1247_s26 = smov [#allocation7]  }
  0x5f   : > { %v347_v15 = vsub.f32 %v239_v4, %v259_v8  ;;  %v354_v16 = vsub.f32 %v240_v7, %v262_v10  ;;  %v321_v17 = vand.u32 4294901760, %v250_v11  ;;  %v974_v18 = vpack.c.bf16 %v262_v10, %v259_v8  ;;  %p1153_p4 = scmp.ne.s32.totalorder %s1466_s10, %s1152_s15  ;;  %s1156_s7 = sshll.u32 %s1247_s26, 4  ;;  %s1157_s7 = int_to_ptr.vmem [resolvable:$false] %s1156_s7 }
  0x60   : > { %972 = vmatpush3.bf16.msra.mxu1 %v971_v12  ;;  %990 = vmatpush3.bf16.msra.mxu0 %v971_v12  ;;  %v334_v19 = vand.u32 4294901760, %v333_v13  ;;  %v341_v20 = vand.u32 4294901760, %v340_v14  ;;  %v983_v39 = vpack.c.bf16 %v340_v14, %v333_v13  ;;  %s1158_s8 = scalar_lea.vmem %s1157_s7, 256  ;;  %p1159_p12 = scmp.lt.s32.totalorder %s1466_s10, %s1157_s7 }
  0x61   : > { %v348_v21 = vand.u32 4294901760, %v347_v15  ;;  %973 = vmatprep.subr.bf16.mxu1 %v1244_v0  ;;  %991 = vmatprep.subr.bf16.mxu0 %v1244_v0  ;;  %v322_v22 = vsub.f32 %v250_v11, %v321_v17  ;;  %v355_v23 = vand.u32 4294901760, %v354_v16  ;;  %v986_v40 = vpack.c.bf16 %v354_v16, %v347_v15  ;;  %p1154_p6 = pnand %p1153_p4, %p1364_p10  ;;  %p1160_p11 = scmp.lt.s32.totalorder %s1158_s8, %s1152_s15 }
  0x62   : > { %v335_v24 = vsub.f32 %v333_v13, %v334_v19  ;;  %v342_v25 = vsub.f32 %v340_v14, %v341_v20  ;;  %v995_v31 = vpack.c.bf16 %v341_v20, %v334_v19 }
  0x63   : > { %v349_v26 = vsub.f32 %v347_v15, %v348_v21  ;;  %v323_v27 = vand.u32 4294901760, %v322_v22  ;;  %v356_v28 = vsub.f32 %v354_v16, %v355_v23  ;;  %v998_v37 = vpack.c.bf16 %v355_v23, %v348_v21  ;;  %p1155_p8 = pneg %p1154_p6  ;;  %p1161_p0 = por %p1160_p11, %p1159_p12 }
  0x64   : > { %975 = vmatpush3.bf16.msra.mxu1 %v974_v18  ;;  %993 = vmatpush3.bf16.msra.mxu0 %v974_v18  ;;  %v336_v29 = vand.u32 4294901760, %v335_v24  ;;  %v343_v30 = vand.u32 4294901760, %v342_v25 }
  0x65   : > { %v324_v32 = vsub.f32 %v322_v22, %v323_v27  ;;  %976 = vmatprep.subr.bf16.mxu1 %v1244_v0  ;;  %994 = vmatprep.subr.bf16.mxu0 %v1244_v0  ;;  %v350_v34 = vand.u32 4294901760, %v349_v26  ;;  %v357_v35 = vand.u32 4294901760, %v356_v28  ;;  %p1162_p5 = pnand %p1161_p0, %p1155_p8 }
  0x66   : > { %v977_v33 = vpack.c.bf16 %v343_v30, %v336_v29 }
  0x67   : > { %v325_v36 = vand.u32 4294901760, %v324_v32  ;;  %946 = vmatmul.mubr.f32.vlgmr.msra.gmra.mrb[0].mxu0 %v323_v27  ;;  %v980_v38 = vpack.c.bf16 %v357_v35, %v350_v34 }
  0x68   : > { %996 = vmatpush3.bf16.msra.mxu0 %v995_v31  ;;  %956 = vmatprep.mubr.msk.f32.mxu0 %vm1245_vm0, %v1246_v1 }
  0x69   : > { %913 = vmatmul.mubr.f32.vlgmr.msra.gmra.mrb[0].mxu1 %v325_v36  ;;  %997 = vmatprep.subr.bf16.mxu0 %v1244_v0 }
  0x6a   : > { %978 = vmatpush3.bf16.msra.mxu1 %v977_v33  ;;  %923 = vmatprep.mubr.msk.f32.mxu1 %vm1245_vm0, %v1246_v1 }
  0x6b   : > { %979 = vmatprep.subr.bf16.mxu1 %v1244_v0 }
  0x6c   : > { %999 = vmatpush3.bf16.msra.mxu0 %v998_v37 }
  0x6d   : > { %1000 = vmatprep.subr.bf16.mxu0 %v1244_v0 }
  0x6e   : > { %981 = vmatpush3.bf16.msra.mxu1 %v980_v38 }
  0x6f   : > { %982 = vmatprep.subr.bf16.mxu1 %v1244_v0  ;;  %957 = vmatmul.mubr.f32.vlgmr.msra.gmra.mrb[0].mxu0 %v321_v17 }
  0x70   : > { %1002 = vmatpush3.bf16.msra.mxu0 %v971_v12  ;;  %967 = vmatprep.mubr.msk.f32.mxu0 %vm1245_vm0, %v1246_v1 }
  0x71   : > { %924 = vmatmul.mubr.f32.vlgmr.msra.gmra.mrb[0].mxu1 %v321_v17  ;;  %1003 = vmatprep.subr.bf16.mxu0 %v1244_v0 }
  0x72   : > { %984 = vmatpush3.bf16.msra.mxu1 %v983_v39  ;;  %934 = vmatprep.mubr.msk.f32.mxu1 %vm1245_vm0, %v1246_v1 }
  0x73   : > { %985 = vmatprep.subr.bf16.mxu1 %v1244_v0 }
  0x74   : > { %1005 = vmatpush3.bf16.msra.mxu0 %v974_v18 }
  0x76   : > { %987 = vmatpush3.bf16.msra.mxu1 %v986_v40 }
  0x77   : > { %968 = vmatmul.mubr.f32.vlgmr.msra.gmra.mrb[0].mxu0 %v321_v17 }
  0x79   : > { %935 = vmatmul.mubr.f32.vlgmr.msra.gmra.mrb[0].mxu1 %v322_v22 }
 0x14a   : > { %v733_v42 = vpop.f32.mrb[0].mxu0 }
 0x14b   : > { %v969_v43 = vpop.f32.mrb[1].mxu0 }
 0x14c   : > { %v498_v44 = vpop.f32.mrb[0].mxu1 }
 0x14d   : > { %v1006_v45 = vadd.f32 %v869_v41, %v498_v44  ;;  %v936_v46 = vpop.f32.mrb[1].mxu1 }
 0x14f   : > { %v1007_v47 = vadd.f32 %v1006_v45, %v733_v42 }
 0x151   : > { %738 = vst.msk [vmem:[%s232_s9] sm:$0xff] %vm737_vm2, %v1007_v47 }
 0x152   : > { %1165 = shalt.err (!%p1162_p5)
}
 0x153   : > { %s1166_s21 = scalar_lea.hbm %s1464_s29, 128  ;;  %s1170_s27 = scalar_lea.hbm %s1516_s3, 256 }
 0x154   : > { %p1167_p9 = scmp.ne.s32.totalorder %s1464_s29, %s1166_s21  ;;  %p1171_p7 = scmp.lt.u32.totalorder %s1464_s29, %s1516_s3 }
 0x155   : > { %p1172_p3 = scmp.lt.u32.totalorder %s1170_s27, %s1166_s21  ;;  %p1174_p4 = scmp.lt.u32.totalorder %s1166_s21, %s1464_s29 }
 0x156   : > { %p1168_p1 = pnand %p1167_p9, %p1364_p10 }
 0x157   : > { %p1173_p13 = por %p1172_p3, %p1171_p7 }
 0x158   : > { %p1169_p2 = pneg %p1168_p1 }
 0x159   : > { %p1175_p6 = por %p1174_p4, %p1173_p13 }
 0x15b   : > { %p1176_p8 = pnand %p1175_p6, %p1169_p2 }
 0x15d   : > { %1179 = shalt.err (!%p1176_p8)
}
 0x15e   : > { %1022 = dma.vmem_to_hbm [thread:$0]  (%p1364_p10), %s1466_s10, 128, %s1464_s29, %s740_s6  }
 0x15f PF: > { %s766_s22 = sand.u32 1, %s1218_s12   ;;  %p1534_p12 = scmp.ne.s32.totalorder %s1524_s23, 0 }
 0x160   : > { %p1535_p11 = scmp.ge.s32.totalorder %s1238_s17, 2  ;;  %s767_s24 = scalar_lea.sflag [#allocation4], %s766_s22 }
 0x162   : > { %p1033_p0 = pnand %p1535_p11, %p1534_p12 }
 0x164   : > { %1213 = dma.done.wait (!%p1033_p0), %s767_s24, 128  }
 0x165   : > { %1215 = vsyncadd (!%p1033_p0), %s767_s24, 4294967168  ;;  %s20_s17 = sadd.s32 1, %s1238_s17   ;;  %s1536_s12 = smov %s1222_s13 }
 0x166   : > { %p17_p5 = scmp.ge.s32.totalorder %s20_s17, 4   ;;  %s1537_s13 = smov %s1226_s14 }
 0x167   : > { %s1538_s14 = smov %s1373_s5  ;;  %s1539_s15 = smov %s1234_s16 }
 0x168   : > { %s1540_s16 = smov %s1542_s28  ;;  %19 = sbr.rel (!%p17_p5) target bundleno = 7 (0x7), region = 85 }
 0x16f   :  { %772 = vsyncpa [#allocation3], 1 }
 0x170   :  { %774 = vsyncpa [#allocation3 + $0x1], 1 }
 0x171   :  { %775 = vsyncpa [#allocation6], 1 }
 0x172   :  { %776 = vsyncpa [#allocation4], 1 }
 0x173   :  { %778 = vsyncpa [#allocation4 + $0x1], 1 }

</bundles_post_ra>
